<compile_context>
chip_gen: v5e
topology: v5e:2x2
jax: 0.10.0
libtpu: 0.0.40
codegen_flags: <defaults>
</compile_context>

<pallas_src>
import functools
import math

import jax
import jax.numpy as jnp
from jax import lax
from jax.experimental import pallas as pl
from jax.experimental.pallas import tpu as pltpu


def _round_up(x, m):
    return ((x + m - 1) // m) * m


def _cdiv(a, b):
    return (a + b - 1) // b


def _tpu_defaults():
    """Return (tq_cap, tk_cap, vmem_limit_bytes) per TPU generation."""
    try:
        kind = jax.devices()[0].device_kind.lower()
    except Exception:  # pragma: no cover - defensive
        kind = ""
    if "v7" in kind or "7x" in kind:
        # v7x: 64 MiB physical VMEM, ~3.2 TB/s HBM per TC.  512-wide tiles
        # amortize the ~0.35us per-grid-step overhead and still fit easily
        # (the double-buffered f32 512x512 out tile is only 2 MiB).
        return 512, 512, 48 * 1024 * 1024
    # v5e / v6e: 128 MiB physical VMEM.
    return 512, 512, 64 * 1024 * 1024


def _pick_tile(total, cap, mult):
    """Largest-useful tile <= cap, multiple of `mult`, minimizing pad waste."""
    total_r = _round_up(total, mult)
    if total_r <= cap:
        return total_r
    n = _cdiv(total, cap)                       # number of tiles
    return _round_up(_cdiv(total, n), mult)     # balanced tile size


def _kqptr_kernel(q_ref, k_ref, maskadd_ref, wq_ref, bq_ref, wk_ref, bk_ref,
                  out_ref, kproj_ref, qproj_ref):
    # Tile shapes seen by the kernel:
    #   q_ref      : (tq, H)        f32
    #   k_ref      : (tk, H)        f32
    #   maskadd_ref: (1, tk)        f32   (already (1 - mask) * -10000)
    #   wq_ref     : (H, D)         bf16  (already scaled by 1/sqrt(D))
    #   bq_ref     : (1, D)         f32   (already scaled by 1/sqrt(D))
    #   wk_ref     : (H, D)         bf16     bk_ref : (1, D) f32
    #   out_ref    : (tq, tk)
    #   kproj_ref  : (tk, D)        bf16 VMEM scratch (carried across qi)
    #   qproj_ref  : (nq, tq, D)    bf16 VMEM scratch (carried across ki)
    ki = pl.program_id(1)
    qi = pl.program_id(2)

    # Key projection: compute once per (b, ki) tile, reuse for all Tq tiles.
    @pl.when(qi == 0)
    def _():
        kp = lax.dot_general(
            k_ref[...].astype(jnp.bfloat16), wk_ref[...],
            dimension_numbers=(((1,), (0,)), ((), ())),
            preferred_element_type=jnp.float32) + bk_ref[...]
        kproj_ref[...] = kp.astype(jnp.bfloat16)

    # Query projection (pre-scaled by 1/sqrt(D)): compute once per (b, qi)
    # tile at ki == 0, cache across the whole ki axis.
    @pl.when(ki == 0)
    def _():
        qp = lax.dot_general(
            q_ref[...].astype(jnp.bfloat16), wq_ref[...],
            dimension_numbers=(((1,), (0,)), ((), ())),
            preferred_element_type=jnp.float32) + bq_ref[...]
        qproj_ref[qi] = qp.astype(jnp.bfloat16)

    # scores = Q @ K^T  (contract on the last dims of both -> no transpose).
    scores = lax.dot_general(
        qproj_ref[qi], kproj_ref[...],
        dimension_numbers=(((1,), (1,)), ((), ())),
        preferred_element_type=jnp.float32)
    scores = scores + maskadd_ref[...]          # (1, tk) broadcast add
    out_ref[...] = scores.astype(out_ref.dtype)


def kq_ptr_net(query_inputs, key_inputs, attention_mask, wq, bq, wk, bk,
               *, tq_cap=None, tk_cap=None, out_dtype=jnp.float32):
    """Pallas implementation of KQPtrNet.forward.

    query_inputs   : f32[B, Tq, H]  (or f32[B, H] for the 2-D / squeeze branch)
    key_inputs     : f32[B, Tk, H]
    attention_mask : f32[B, Tk]
    wq, wk         : f32[H, D]      (already transposed vs torch Linear.weight)
    bq, bk         : f32[D]
    out_dtype      : jnp.float32 (default) or jnp.bfloat16 to halve the
                     dominant HBM write traffic on the scores.
    returns        : [B, Tq, Tk]    (or [B, Tk] for the 2-D query branch)
    """
    squeeze_result = query_inputs.ndim == 2
    if squeeze_result:
        query_inputs = query_inputs[:, None, :]

    B, Tq, H = query_inputs.shape
    _, Tk, _ = key_inputs.shape
    D = wq.shape[1]

    dflt_tq, dflt_tk, vmem_limit = _tpu_defaults()
    tq_cap = dflt_tq if tq_cap is None else tq_cap
    tk_cap = dflt_tk if tk_cap is None else tk_cap

    # Balanced tile sizes: tq multiple of 8, tk multiple of 128 (lane-dense
    # stores), both sized to minimize padding waste for ragged shapes.
    tq = _pick_tile(Tq, tq_cap, 8)
    tk = _pick_tile(Tk, tk_cap, 128)
    Tq_pad = _round_up(Tq, tq)
    Tk_pad = _round_up(Tk, tk)
    nq = Tq_pad // tq
    nk = Tk_pad // tk

    inv_sqrt_d = 1.0 / math.sqrt(D)

    # Additive mask precomputed in the wrapper (tiny [B, Tk] array); padded
    # key columns get the -10000 sentinel (they are trimmed anyway).
    mask_add = (1.0 - attention_mask.astype(jnp.float32)) * (-10000.0)

    q = query_inputs.astype(jnp.float32)
    k = key_inputs.astype(jnp.float32)
    if Tq_pad != Tq:
        q = jnp.pad(q, ((0, 0), (0, Tq_pad - Tq), (0, 0)))
    if Tk_pad != Tk:
        k = jnp.pad(k, ((0, 0), (0, Tk_pad - Tk), (0, 0)))
        mask_add = jnp.pad(mask_add, ((0, 0), (0, Tk_pad - Tk)),
                           constant_values=-10000.0)
    mask3 = mask_add.reshape(B, 1, Tk_pad)

    # Fold 1/sqrt(D) into the query projection (exact algebraic rewrite);
    # weights go to bf16 (f32 MXU accumulate inside the kernel), biases f32.
    wq_bf = (wq.astype(jnp.float32) * inv_sqrt_d).astype(jnp.bfloat16)
    bq2 = (bq.astype(jnp.float32) * inv_sqrt_d).reshape(1, D)
    wk_bf = wk.astype(jnp.bfloat16)
    bk2 = bk.astype(jnp.float32).reshape(1, D)

    grid = (B, nk, nq)

    out = pl.pallas_call(
        _kqptr_kernel,
        out_shape=jax.ShapeDtypeStruct((B, Tq_pad, Tk_pad), out_dtype),
        grid_spec=pltpu.PrefetchScalarGridSpec(
            num_scalar_prefetch=0,
            grid=grid,
            in_specs=[
                # query tile: depends on (b, qi)
                pl.BlockSpec((pl.Squeezed(), tq, H),
                             lambda b, ki, qi: (b, qi, 0)),
                # key tile: depends on (b, ki)
                pl.BlockSpec((pl.Squeezed(), tk, H),
                             lambda b, ki, qi: (b, ki, 0)),
                # additive mask tile: depends on (b, ki)
                pl.BlockSpec((pl.Squeezed(), 1, tk),
                             lambda b, ki, qi: (b, 0, ki)),
                # weights / biases: resident (block index never changes).
                # NOTE: default double-buffering keeps 2 copies of each; only
                # a concern for multi-MiB H*D weights on v7x's 64 MiB VMEM.
                pl.BlockSpec((H, D), lambda b, ki, qi: (0, 0)),
                pl.BlockSpec((1, D), lambda b, ki, qi: (0, 0)),
                pl.BlockSpec((H, D), lambda b, ki, qi: (0, 0)),
                pl.BlockSpec((1, D), lambda b, ki, qi: (0, 0)),
            ],
            out_specs=pl.BlockSpec((pl.Squeezed(), tq, tk),
                                   lambda b, ki, qi: (b, qi, ki)),
            scratch_shapes=[
                pltpu.VMEM((tk, D), jnp.bfloat16),       # K projection cache
                pltpu.VMEM((nq, tq, D), jnp.bfloat16),   # Q projection cache
            ],
        ),
        compiler_params=pltpu.CompilerParams(
            # qi carries the K-projection cache and ki carries the
            # Q-projection cache -> both "arbitrary"; the batch axis is
            # independent and megacore-shardable (v7x 2 TCs).
            dimension_semantics=("parallel", "arbitrary", "arbitrary"),
            vmem_limit_bytes=vmem_limit,
        ),
    )(q, k, mask3, wq_bf, bq2, wk_bf, bk2)

    # Only trim when we actually padded (the slice copy re-touches the
    # largest tensor in HBM, so avoid it for aligned shapes).
    if Tq_pad != Tq or Tk_pad != Tk:
        out = out[:, :Tq, :Tk]
    if squeeze_result:
        out = out[:, 0, :]
    return out


def _reference(query_inputs, key_inputs, attention_mask, wq, bq, wk, bk):
    D = wq.shape[1]
    ext = ((1.0 - attention_mask) * -10000.0)[:, None, :]       # [B,1,Tk]
    q3 = query_inputs if query_inputs.ndim == 3 else query_inputs[:, None, :]
    ql = jnp.einsum("bqh,hd->bqd", q3, wq) + bq
    kl = jnp.einsum("bkh,hd->bkd", key_inputs, wk) + bk
    scores = jnp.einsum("bqd,bkd->bqk", ql, kl) / math.sqrt(D) + ext
    if query_inputs.ndim == 2:
        scores = scores[:, 0, :]
    return scores


def _make_params(key, H, D):
    k1, k2, k3, k4 = jax.random.split(key, 4)
    bound = 1.0 / math.sqrt(H)
    wq = jax.random.uniform(k1, (H, D), minval=-bound, maxval=bound,
                            dtype=jnp.float32)
    bq = jax.random.uniform(k2, (D,), minval=-bound, maxval=bound,
                            dtype=jnp.float32)
    wk = jax.random.uniform(k3, (H, D), minval=-bound, maxval=bound,
                            dtype=jnp.float32)
    bk = jax.random.uniform(k4, (D,), minval=-bound, maxval=bound,
                            dtype=jnp.float32)
    return wq, bq, wk, bk


if __name__ == "__main__":
    # bf16 matmul inputs -> compare against the f32 reference with a loose
    # (but still tight for these magnitudes) tolerance.
    ATOL = RTOL = 5e-2

    root = jax.random.PRNGKey(0)

    # ---- Test 1: basic 3-D query branch (module-default shapes) -----------
    B, Tq, Tk, H = 2, 8, 8, 32
    D = H  # query_key_size defaults to hidden_size
    k1, k2, k3, kp = jax.random.split(root, 4)
    q = jax.random.normal(k1, (B, Tq, H), dtype=jnp.float32)
    kv = jax.random.normal(k2, (B, Tk, H), dtype=jnp.float32)
    mask = (jax.random.uniform(k3, (B, Tk)) > 0.5).astype(jnp.float32)
    wq, bq, wk, bk = _make_params(kp, H, D)

    out = jax.block_until_ready(kq_ptr_net(q, kv, mask, wq, bq, wk, bk))
    ref = _reference(q, kv, mask, wq, bq, wk, bk)
    assert out.shape == (B, Tq, Tk)
    assert jnp.allclose(out, ref, atol=ATOL, rtol=RTOL)

    # ---- Test 2: uneven shapes, multiple q- AND k-tiles (both caches) -----
    B2, Tq2, Tk2, H2, D2 = 3, 24, 200, 32, 16
    k1, k2, k3, kp = jax.random.split(jax.random.PRNGKey(1), 4)
    q2 = jax.random.normal(k1, (B2, Tq2, H2), dtype=jnp.float32)
    kv2 = jax.random.normal(k2, (B2, Tk2, H2), dtype=jnp.float32)
    mask2 = (jax.random.uniform(k3, (B2, Tk2)) > 0.3).astype(jnp.float32)
    wq2, bq2, wk2, bk2 = _make_params(kp, H2, D2)

    out2 = jax.block_until_ready(
        kq_ptr_net(q2, kv2, mask2, wq2, bq2, wk2, bk2,
                   tq_cap=8, tk_cap=128))   # forces 3 q-tiles x 2 k-tiles
    ref2 = _reference(q2, kv2, mask2, wq2, bq2, wk2, bk2)
    assert out2.shape == (B2, Tq2, Tk2)
    assert jnp.allclose(out2, ref2, atol=ATOL, rtol=RTOL)

    # ---- Test 3: 2-D query branch (squeeze_result path of the module) -----
    k1, _ = jax.random.split(jax.random.PRNGKey(2))
    q1d = jax.random.normal(k1, (B, H), dtype=jnp.float32)
    out3 = jax.block_until_ready(kq_ptr_net(q1d, kv, mask, wq, bq, wk, bk))
    ref3 = _reference(q1d, kv, mask, wq, bq, wk, bk)
    assert out3.shape == (B, Tk)
    assert jnp.allclose(out3, ref3, atol=ATOL, rtol=RTOL)

    # ---- Test 4: bf16 output path (halves HBM write traffic) --------------
    out4 = jax.block_until_ready(
        kq_ptr_net(q, kv, mask, wq, bq, wk, bk, out_dtype=jnp.bfloat16))
    assert out4.dtype == jnp.bfloat16
    assert jnp.allclose(out4.astype(jnp.float32), ref, atol=0.1, rtol=0.1)

    print("KERNEL_OK")
</pallas_src>

<mosaic_0001>
module attributes {stable_mosaic.version = 11 : i64} {
  func.func @_kqptr_kernel(%arg0: i32, %arg1: i32, %arg2: i32, %arg3: memref<1x8x32xf32, #tpu.memory_space<vmem>>, %arg4: memref<1x128x32xf32, #tpu.memory_space<vmem>>, %arg5: memref<1x1x128xf32, #tpu.memory_space<vmem>>, %arg6: memref<32x32xbf16, #tpu.memory_space<vmem>>, %arg7: memref<1x32xf32, #tpu.memory_space<vmem>>, %arg8: memref<32x32xbf16, #tpu.memory_space<vmem>>, %arg9: memref<1x32xf32, #tpu.memory_space<vmem>>, %arg10: memref<1x8x128xf32, #tpu.memory_space<vmem>>, %arg11: memref<128x32xbf16, #tpu.memory_space<vmem>>, %arg12: memref<1x8x32xbf16, #tpu.memory_space<vmem>>) attributes {dimension_semantics = [#tpu.dimension_semantics<parallel>, #tpu.dimension_semantics<arbitrary>, #tpu.dimension_semantics<arbitrary>], iteration_bounds = array<i64: 2, 1, 1>, scalar_prefetch = 0 : i64, scratch_operands = 2 : i64, tpu.core_type = #tpu.core_type<tc>, window_params = [{transform_indices = @transform_0, window_bounds = array<i64: 1, 8, 32>}, {transform_indices = @transform_1, window_bounds = array<i64: 1, 128, 32>}, {transform_indices = @transform_2, window_bounds = array<i64: 1, 1, 128>}, {pipeline_mode = #tpu.pipeline_mode<synchronous>, transform_indices = @transform_3, window_bounds = array<i64: 32, 32>}, {pipeline_mode = #tpu.pipeline_mode<synchronous>, transform_indices = @transform_4, window_bounds = array<i64: 1, 32>}, {pipeline_mode = #tpu.pipeline_mode<synchronous>, transform_indices = @transform_5, window_bounds = array<i64: 32, 32>}, {pipeline_mode = #tpu.pipeline_mode<synchronous>, transform_indices = @transform_6, window_bounds = array<i64: 1, 32>}, {transform_indices = @transform_7, window_bounds = array<i64: 1, 8, 128>}]} {
    %c0_i32 = arith.constant 0 : i32
    %0 = arith.cmpi eq, %arg2, %c0_i32 : i32
    %1 = arith.extui %0 : i1 to i32
    %c0_i32_0 = arith.constant 0 : i32
    %2 = arith.cmpi ne, %1, %c0_i32_0 : i32
    scf.if %2 {
      %c0_12 = arith.constant 0 : index
      %c0_13 = arith.constant 0 : index
      %c0_14 = arith.constant 0 : index
      %18 = vector.load %arg4[%c0_12, %c0_13, %c0_14] : memref<1x128x32xf32, #tpu.memory_space<vmem>>, vector<1x128x32xf32>
      %19 = vector.shape_cast %18 : vector<1x128x32xf32> to vector<128x32xf32>
      %20 = arith.truncf %19 : vector<128x32xf32> to vector<128x32xbf16>
      %c0_15 = arith.constant 0 : index
      %c0_16 = arith.constant 0 : index
      %21 = vector.load %arg8[%c0_15, %c0_16] : memref<32x32xbf16, #tpu.memory_space<vmem>>, vector<32x32xbf16>
      %cst_17 = arith.constant dense<0.000000e+00> : vector<128x32xf32>
      %22 = tpu.matmul %20, %21, %cst_17 {dimension_numbers = #tpu.dot_dimension_numbers<[1], [0], [0], [1], [0, 0, 1, 1], [], []>} : vector<128x32xbf16>, vector<32x32xbf16>, vector<128x32xf32> -> vector<128x32xf32>
      %c0_18 = arith.constant 0 : index
      %c0_19 = arith.constant 0 : index
      %23 = vector.load %arg9[%c0_18, %c0_19] : memref<1x32xf32, #tpu.memory_space<vmem>>, vector<1x32xf32>
      %24 = vector.broadcast %23 : vector<1x32xf32> to vector<128x32xf32>
      %25 = arith.addf %22, %24 : vector<128x32xf32>
      %26 = arith.truncf %25 : vector<128x32xf32> to vector<128x32xbf16>
      %c0_20 = arith.constant 0 : index
      %c0_21 = arith.constant 0 : index
      %27 = vector.load %arg11[%c0_20, %c0_21] : memref<128x32xbf16, #tpu.memory_space<vmem>>, vector<128x32xbf16>
      tpu.vector_store %arg11[%c0_20, %c0_21], %26 {strides = array<i32>} : memref<128x32xbf16, #tpu.memory_space<vmem>>, vector<128x32xbf16>,
    } else {
    }
    %c0_i32_1 = arith.constant 0 : i32
    %3 = arith.cmpi eq, %arg1, %c0_i32_1 : i32
    %4 = arith.extui %3 : i1 to i32
    %c0_i32_2 = arith.constant 0 : i32
    %5 = arith.cmpi ne, %4, %c0_i32_2 : i32
    scf.if %5 {
      %c0_12 = arith.constant 0 : index
      %c0_13 = arith.constant 0 : index
      %c0_14 = arith.constant 0 : index
      %18 = vector.load %arg3[%c0_12, %c0_13, %c0_14] : memref<1x8x32xf32, #tpu.memory_space<vmem>>, vector<1x8x32xf32>
      %19 = vector.shape_cast %18 : vector<1x8x32xf32> to vector<8x32xf32>
      %20 = arith.truncf %19 : vector<8x32xf32> to vector<8x32xbf16>
      %c0_15 = arith.constant 0 : index
      %c0_16 = arith.constant 0 : index
      %21 = vector.load %arg6[%c0_15, %c0_16] : memref<32x32xbf16, #tpu.memory_space<vmem>>, vector<32x32xbf16>
      %cst_17 = arith.constant dense<0.000000e+00> : vector<8x32xf32>
      %22 = tpu.matmul %20, %21, %cst_17 {dimension_numbers = #tpu.dot_dimension_numbers<[1], [0], [0], [1], [0, 0, 1, 1], [], []>} : vector<8x32xbf16>, vector<32x32xbf16>, vector<8x32xf32> -> vector<8x32xf32>
      %c0_18 = arith.constant 0 : index
      %c0_19 = arith.constant 0 : index
      %23 = vector.load %arg7[%c0_18, %c0_19] : memref<1x32xf32, #tpu.memory_space<vmem>>, vector<1x32xf32>
      %24 = vector.broadcast %23 : vector<1x32xf32> to vector<8x32xf32>
      %25 = arith.addf %22, %24 : vector<8x32xf32>
      %26 = arith.truncf %25 : vector<8x32xf32> to vector<8x32xbf16>
      %27 = arith.index_cast %arg2 : i32 to index
      %c0_20 = arith.constant 0 : index
      %c0_21 = arith.constant 0 : index
      %28 = vector.load %arg12[%27, %c0_20, %c0_21] : memref<1x8x32xbf16, #tpu.memory_space<vmem>>, vector<1x8x32xbf16>
      %29 = vector.shape_cast %28 : vector<1x8x32xbf16> to vector<8x32xbf16>
      %30 = vector.shape_cast %26 : vector<8x32xbf16> to vector<1x8x32xbf16>
      tpu.vector_store %arg12[%27, %c0_20, %c0_21], %30 {strides = array<i32>} : memref<1x8x32xbf16, #tpu.memory_space<vmem>>, vector<1x8x32xbf16>,
    } else {
    }
    %6 = arith.index_cast %arg2 : i32 to index
    %c0 = arith.constant 0 : index
    %c0_3 = arith.constant 0 : index
    %7 = vector.load %arg12[%6, %c0, %c0_3] : memref<1x8x32xbf16, #tpu.memory_space<vmem>>, vector<1x8x32xbf16>
    %8 = vector.shape_cast %7 : vector<1x8x32xbf16> to vector<8x32xbf16>
    %c0_4 = arith.constant 0 : index
    %c0_5 = arith.constant 0 : index
    %9 = vector.load %arg11[%c0_4, %c0_5] : memref<128x32xbf16, #tpu.memory_space<vmem>>, vector<128x32xbf16>
    %cst = arith.constant dense<0.000000e+00> : vector<8x128xf32>
    %10 = tpu.matmul %8, %9, %cst {dimension_numbers = #tpu.dot_dimension_numbers<[1], [1], [0], [0], [0, 0, 1, 0], [], []>} : vector<8x32xbf16>, vector<128x32xbf16>, vector<8x128xf32> -> vector<8x128xf32>
    %c0_6 = arith.constant 0 : index
    %c0_7 = arith.constant 0 : index
    %c0_8 = arith.constant 0 : index
    %11 = vector.load %arg5[%c0_6, %c0_7, %c0_8] : memref<1x1x128xf32, #tpu.memory_space<vmem>>, vector<1x1x128xf32>
    %12 = vector.shape_cast %11 : vector<1x1x128xf32> to vector<1x128xf32>
    %13 = vector.broadcast %12 : vector<1x128xf32> to vector<8x128xf32>
    %14 = arith.addf %10, %13 : vector<8x128xf32>
    %c0_9 = arith.constant 0 : index
    %c0_10 = arith.constant 0 : index
    %c0_11 = arith.constant 0 : index
    %15 = vector.load %arg10[%c0_9, %c0_10, %c0_11] : memref<1x8x128xf32, #tpu.memory_space<vmem>>, vector<1x8x128xf32>
    %16 = vector.shape_cast %15 : vector<1x8x128xf32> to vector<8x128xf32>
    %17 = vector.shape_cast %14 : vector<8x128xf32> to vector<1x8x128xf32>
    tpu.vector_store %arg10[%c0_9, %c0_10, %c0_11], %17 {strides = array<i32>} : memref<1x8x128xf32, #tpu.memory_space<vmem>>, vector<1x8x128xf32>,
    return
  }
  func.func @transform_0(%arg0: i32, %arg1: i32, %arg2: i32) -> (i32, i32, i32) {
    %c0_i32 = arith.constant 0 : i32
    %c0_i32_0 = arith.constant 0 : i32
    return %arg0, %arg2, %c0_i32 : i32, i32, i32
  }
  func.func @transform_1(%arg0: i32, %arg1: i32, %arg2: i32) -> (i32, i32, i32) {
    %c0_i32 = arith.constant 0 : i32
    %c0_i32_0 = arith.constant 0 : i32
    return %arg0, %arg1, %c0_i32 : i32, i32, i32
  }
  func.func @transform_2(%arg0: i32, %arg1: i32, %arg2: i32) -> (i32, i32, i32) {
    %c0_i32 = arith.constant 0 : i32
    %c0_i32_0 = arith.constant 0 : i32
    return %arg0, %c0_i32, %arg1 : i32, i32, i32
  }
  func.func @transform_3(%arg0: i32, %arg1: i32, %arg2: i32) -> (i32, i32) {
    %c0_i32 = arith.constant 0 : i32
    %c0_i32_0 = arith.constant 0 : i32
    %c0_i32_1 = arith.constant 0 : i32
    return %c0_i32, %c0_i32_0 : i32, i32
  }
  func.func @transform_4(%arg0: i32, %arg1: i32, %arg2: i32) -> (i32, i32) {
    %c0_i32 = arith.constant 0 : i32
    %c0_i32_0 = arith.constant 0 : i32
    %c0_i32_1 = arith.constant 0 : i32
    return %c0_i32, %c0_i32_0 : i32, i32
  }
  func.func @transform_5(%arg0: i32, %arg1: i32, %arg2: i32) -> (i32, i32) {
    %c0_i32 = arith.constant 0 : i32
    %c0_i32_0 = arith.constant 0 : i32
    %c0_i32_1 = arith.constant 0 : i32
    return %c0_i32, %c0_i32_0 : i32, i32
  }
  func.func @transform_6(%arg0: i32, %arg1: i32, %arg2: i32) -> (i32, i32) {
    %c0_i32 = arith.constant 0 : i32
    %c0_i32_0 = arith.constant 0 : i32
    %c0_i32_1 = arith.constant 0 : i32
    return %c0_i32, %c0_i32_0 : i32, i32
  }
  func.func @transform_7(%arg0: i32, %arg1: i32, %arg2: i32) -> (i32, i32, i32) {
    %c0_i32 = arith.constant 0 : i32
    return %arg0, %arg2, %arg1 : i32, i32, i32
  }
}

</mosaic_0001>

<bundles_post_ra>
// kernel: tpu_custom_call.1
= control target key start
LH: loop header
LB: loop body
LE: loop exit
PB: predicated region body
PF: predicated region fallthrough
CT: control target
= control target key end

     0   :  { %s1271_s0 = inlined_call_operand.vmem [shape: f32[2,8,32], index: 0, kind: input, shape index: {}]   ;;  %s1272_s1 = inlined_call_operand.vmem [shape: f32[2,128,32], index: 1, kind: input, shape index: {}]   ;;  %s1273_s2 = inlined_call_operand.vmem [shape: f32[2,1,128], index: 2, kind: input, shape index: {}]   ;;  %s1274_s3 = inlined_call_operand.vmem [shape: bf16[32,32], index: 3, kind: input, shape index: {}]   ;;  %s1275_s4 = inlined_call_operand.vmem [shape: f32[1,32], index: 4, kind: input, shape index: {}]   ;;  %s1276_s5 = inlined_call_operand.vmem [shape: bf16[32,32], index: 5, kind: input, shape index: {}]   ;;  %s1277_s6 = inlined_call_operand.vmem [shape: f32[1,32], index: 6, kind: input, shape index: {}]   ;;  %s1278_s7 = inlined_call_operand.hbm [shape: f32[2,8,128], index: 7, kind: output, shape index: {}]  }
   0x1   :  { %1279 = sst [smem:[#allocation7_spill]] %s1271_s0 }
   0x2   :  { %1280 = sst [smem:[#allocation8_spill]] %s1272_s1 }
   0x3   :  { %12 = vsyncpa [#allocation5], 0 }
   0x4   :  { %14 = vsyncpa [#allocation5 + $0x1], 0  ;;  %s1069_s24 = smov 0   ;;  %s1071_s25 = smov 0  }
   0x5   :  { %s1073_s26 = smov 0   ;;  %s1075_s27 = smov 0  }
   0x6   :  { %s1077_s28 = smov 0   ;;  %s1079_s29 = smov 0  }
   0x7 LB: > { %s805_s30 = sadd.s32 4294967295, %s1027_s29   ;;  %s806_s8 = sadd.s32 4294967294, %s1027_s29   ;;  %s1027_s29 = sphi %s1079_s29, %s20_s29   ;;  %s1023_s28 = sphi %s1077_s28, %s1289_s28   ;;  %s1019_s27 = sphi %s1075_s27, %s1288_s27   ;;  %s1015_s26 = sphi %s1073_s26, %s1287_s26   ;;  %s1011_s25 = sphi %s1071_s25, %s1286_s25   ;;  %s1007_s24 = sphi %s1069_s24, %s1285_s24  }
   0x8   : > { %s39_s9 = sadd.s32 1, %s1023_s28  ;;  %s218_s10 = sadd.s32 1, %s1015_s26 }
   0x9   : > { %p41_p0 = scmp.ge.s32.totalorder %s39_s9, 2  ;;  %p228_p1 = scmp.ne.s32.totalorder %s1015_s26, %s1011_s25 }
   0xa   : > { %p229_p2 = scmp.eq.s32.totalorder %s805_s30, 1  ;;  %p234_p3 = scmp.ne.s32.totalorder %s1011_s25, %s1007_s24 }
   0xb   : > { %s1291_s9 = smov (%p41_p0, %s39_s9), 0  ;;  %p235_p5 = scmp.eq.s32.totalorder %s806_s8, 1 }
   0xc   : > { %p1109_p4 = por %p229_p2, %p228_p1  ;;  %s211_s12 = ssub.s32 %s1023_s28, %s1291_s9 }
   0xd   : > { %p809_p6 = scmp.ge.s32.totalorder %s1027_s29, 1  ;;  %p216_p7 = scmp.eq.s32.totalorder %s211_s12, 0 }
   0xe   : > { %p1116_p8 = por %p235_p5, %p234_p3  ;;  %p297_p9 = scmp.lt.s32.totalorder %s1027_s29, 3 }
   0xf   : > { %s1122_s14 = scalar_select %p216_p7, %s1015_s26, %s218_s10  }
  0x10   : > { %p298_p10 = pnand %p809_p6, %p297_p9 }
  0x11   : > { %p346_p11 = scmp.lt.s32.totalorder (!%p298_p10), %s1019_s27, 1  ;;  %s1283_s1 = sld [smem:[#allocation8_spill]] (!%p298_p10) }
  0x12   : > { %301 = sbr.rel (%p298_p10) target bundleno = 435 (0x1b3), region = 48  ;;  %s1284_s0 = sld [smem:[#allocation7_spill]] (!%p298_p10) }
  0x13   : > { %s873_s15 = sshll.u32 (!%p298_p10), %s1019_s27, 3 }
  0x17   : > { %v878_v0 = vld [vmem:[%s1276_s5 + $0x8] sm:$0xff]  ;;  %v877_v1 = vld [vmem:[%s1276_s5] sm:$0xff]  ;;  %s1132_s19 = scalar_select %p346_p11, %s1019_s27, 1  ;;  %vm418_vm0 = vcmask 261120   ;;  %vm508_vm1 = vcmask 257024  }
  0x18   : > { %889 = vmatpush.bf16.msra.mxu3 %v878_v0  ;;  %449 = vmatpush.bf16.msra.mxu0 %v878_v0  ;;  %v880_v14 = vld [vmem:[%s1274_s3 + $0x8] sm:$0xff]  ;;  %v879_v15 = vld [vmem:[%s1274_s3] sm:$0xff] }
  0x19   : > { %s876_s20 = sshll.u32 %s1132_s19, 7  ;;  %s811_s30 = sshll.u32 %s1132_s19, 3  ;;  %561 = vmatpush.bf16.msra.mxu1 %v880_v14  ;;  %v1178_v30 = vld [vmem:[%s1277_s6] ss:$0 sm:$0xff] }
  0x1a   : > { %s1138_s23 = scalar_lea.vmem %s1283_s1, %s876_s20  ;;  %s352_s12 = scalar_lea.vmem %s1284_s0, %s811_s30 }
  0x1b   : > { %v382_v2 = vld [vmem:[%s1138_s23 + $0x40] sm:$0xff]  ;;  %v383_v3 = vld [vmem:[%s1138_s23 + $0x48] sm:$0xff]  ;;  %v384_v8 = vld [vmem:[%s1138_s23 + $0x50] sm:$0xff]  ;;  %s368_s30 = scalar_lea.vmem %s1273_s2, %s1132_s19  ;;  %s691_s20 = scalar_lea.hbm %s1278_s7, %s873_s15 }
  0x1c   : > { %890 = vmatpush.bf16.msra.mxu3 %v877_v1  ;;  %450 = vmatpush.bf16.msra.mxu0 %v877_v1  ;;  %v394_v4 = vpack.c.bf16 %v383_v3, %v382_v2  ;;  %v374_v5 = vld [vmem:[%s1138_s23] sm:$0xff]  ;;  %v375_v6 = vld [vmem:[%s1138_s23 + $0x8] sm:$0xff]  ;;  %v385_v9 = vld [vmem:[%s1138_s23 + $0x58] sm:$0xff]  ;;  %s695_s10 = sshll.u32 %s691_s20, 4  ;;  %s969_s19 = scalar_lea.hbm %s1278_s7, 16  ;;  %s696_s10 = int_to_ptr.hbm [resolvable:$true] %s695_s10 }
  0x1d   : > { %v390_v7 = vpack.c.bf16 %v375_v6, %v374_v5  ;;  %v376_v10 = vld [vmem:[%s1138_s23 + $0x10] sm:$0xff]  ;;  %v377_v11 = vld [vmem:[%s1138_s23 + $0x18] sm:$0xff]  ;;  %v395_v12 = vpack.c.bf16 %v385_v9, %v384_v8  ;;  %v529_v16 = vld [vmem:[%s352_s12] sm:$0xff]  ;;  %562 = vmatpush.bf16.msra.mxu1 %v879_v15  ;;  %s343_s12 = sand.u32 1, %s1011_s25   ;;  %s963_s0 = sshra.s32 %s696_s10, 4  ;;  %s964_s0 = int_to_ptr.hbm [resolvable:$true] %s963_s0 }
  0x1e   : > { %v391_v13 = vpack.c.bf16 %v377_v11, %v376_v10  ;;  %v530_v17 = vpack.c.bf16 %v529_v16, %v529_v16  ;;  %v386_v18 = vld [vmem:[%s1138_s23 + $0x60] sm:$0xff]  ;;  %v387_v19 = vld [vmem:[%s1138_s23 + $0x68] sm:$0xff]  ;;  %v388_v24 = vld [vmem:[%s1138_s23 + $0x70] sm:$0xff]  ;;  %s810_s16 = sshll.u32 %s343_s12, 3  ;;  %s679_s27 = scalar_lea.sflag [#allocation5], %s343_s12 }
  0x1f   : > { %826 = vmatmul.msk.bf16.vlgmr.msra.gmra.mxu3 %vm418_vm0, %v394_v4  ;;  %822 = vmatmul.msk.bf16.vlgmr.msra.gmra.mxu0 %vm418_vm0, %v390_v7  ;;  %v378_v20 = vld [vmem:[%s1138_s23 + $0x20] sm:$0xff]  ;;  %v379_v21 = vld [vmem:[%s1138_s23 + $0x28] sm:$0xff]  ;;  %v396_v22 = vpack.c.bf16 %v387_v19, %v386_v18  ;;  %v389_v25 = vld [vmem:[%s1138_s23 + $0x78] sm:$0xff]  ;;  %s965_s1 = scalar_lea.hbm %s964_s0, 8  ;;  %p970_p1 = scmp.lt.s32.totalorder %s964_s0, %s1278_s7 }
  0x20   : > { %838 = vmatmul.msk.bf16.vlgmr.msra.gmra.mxu1 %vm418_vm0, %v530_v17  ;;  %v392_v23 = vpack.c.bf16 %v379_v21, %v378_v20  ;;  %v380_v26 = vld [vmem:[%s1138_s23 + $0x30] sm:$0xff]  ;;  %v381_v27 = vld [vmem:[%s1138_s23 + $0x38] sm:$0xff]  ;;  %v397_v28 = vpack.c.bf16 %v389_v25, %v388_v24  ;;  %v947_v19 = vld [vmem:[%s1275_s4] ss:$0 sm:$0xff]  ;;  %s345_s23 = scalar_lea.vmem [#allocation4], %s810_s16  ;;  %p966_p12 = scmp.ne.s32.totalorder %s964_s0, %s965_s1 }
  0x21   : > { %v393_v29 = vpack.c.bf16 %v381_v27, %v380_v26  ;;  %s693_s8 = sshll.u32 %s345_s23, 4  ;;  %p971_p2 = scmp.lt.s32.totalorder %s969_s19, %s965_s1  ;;  %s694_s8 = int_to_ptr.vmem [resolvable:$true] %s693_s8 }
  0x22   : > { %p967_p13 = pnand %p966_p12, %p1109_p4 }
  0x23   : > { %p972_p3 = por %p971_p2, %p970_p1 }
  0x24   : > { %p968_p0 = pneg %p967_p13 }
  0x26   : > { %p973_p5 = pnand %p972_p3, %p968_p0 }
  0x2f   : > { %827 = vmatmul.msk.bf16.gmra.mxu3 %vm418_vm0, %v395_v12  ;;  %823 = vmatmul.msk.bf16.gmra.mxu0 %vm418_vm0, %v391_v13 }
  0x3f   : > { %828 = vmatmul.msk.bf16.gmra.mxu3 %vm418_vm0, %v396_v22  ;;  %824 = vmatmul.msk.bf16.gmra.mxu0 %vm418_vm0, %v392_v23 }
  0x4f   : > { %829 = vmatmul.msk.bf16.gmra.mxu3 %vm418_vm0, %v397_v28  ;;  %825 = vmatmul.msk.bf16.gmra.mxu0 %vm418_vm0, %v393_v29 }
  0x9c   : > { %v452_v31 = vpop.f32.mrf.mxu0 }
  0x9d   : > { %v453_v32 = vadd.f32 %v1178_v30, %v452_v31  ;;  %v564_v20 = vpop.f32.mrf.mxu1 }
  0x9e   : > { %v565_v21 = vadd.f32 %v947_v19, %v564_v20 }
  0x9f   : > { %v492_v33 = vpack.c.bf16 %v453_v32, %v453_v32 }
  0xa0   : > { %v568_v23 = vpack.c.bf16 %v565_v21, %v565_v21 }
  0xa1   : > { %509 = vst.msk [vmem:[#allocation2] sm:$0xf] %vm508_vm1, %v492_v33 }
  0xa2   : > { %v472_v34 = vpop.f32.mrf.mxu3  ;;  %572 = vst.msk [vmem:[#allocation3] sm:$0xf] %vm508_vm1, %v568_v23 }
  0xa3   : > { %v473_v35 = vadd.f32 %v1178_v30, %v472_v34 }
  0xa4   : > { %v454_v37 = vpop.f32.mrf.mxu0 }
  0xa5   : > { %v500_v36 = vpack.c.bf16 %v473_v35, %v473_v35  ;;  %v455_v38 = vadd.f32 %v1178_v30, %v454_v37  ;;  %v566_v25 = vpop.f32.mrf.mxu1  ;;  %v948_v37 = vld [vmem:[%s368_s30] ss:$0 sm:$0xff] }
  0xa7   : > { %517 = vst.msk [vmem:[#allocation2 + $0x20] sm:$0xf] %vm508_vm1, %v500_v36  ;;  %v493_v39 = vpack.c.bf16 %v455_v38, %v455_v38 }
  0xa9   : > { %510 = vst.msk [vmem:[#allocation2 + $0x4] sm:$0xf] %vm508_vm1, %v493_v39  ;;  %v575_v36 = vld [vmem:[#allocation3] sm:$0xf] }
  0xaa   : > { %v474_v40 = vpop.f32.mrf.mxu3 }
  0xab   : > { %v475_v41 = vadd.f32 %v1178_v30, %v474_v40 }
  0xac   : > { %v457_v43 = vpop.f32.mrf.mxu0 }
  0xad   : > { %v501_v42 = vpack.c.bf16 %v475_v41, %v475_v41  ;;  %v458_v44 = vadd.f32 %v1178_v30, %v457_v43 }
  0xaf   : > { %518 = vst.msk [vmem:[#allocation2 + $0x24] sm:$0xf] %vm508_vm1, %v501_v42  ;;  %v494_v45 = vpack.c.bf16 %v458_v44, %v458_v44 }
  0xb0   : > { %v881_v34 = vld [vmem:[#allocation2] sm:$0xff] }
  0xb1   : > { %511 = vst.msk [vmem:[#allocation2 + $0x8] sm:$0xf] %vm508_vm1, %v494_v45  ;;  %v641_v35 = vsel %vm418_vm0, %v881_v34, 0 }
  0xb2   : > { %v477_v46 = vpop.f32.mrf.mxu3 }
  0xb3   : > { %v478_v47 = vadd.f32 %v1178_v30, %v477_v46 }
  0xb4   : > { %v459_v49 = vpop.f32.mrf.mxu0 }
  0xb5   : > { %v502_v48 = vpack.c.bf16 %v478_v47, %v478_v47  ;;  %v460_v50 = vadd.f32 %v1178_v30, %v459_v49 }
  0xb6   : > { %v885_v26 = vld [vmem:[#allocation2 + $0x20] sm:$0xff] }
  0xb7   : > { %519 = vst.msk [vmem:[#allocation2 + $0x28] sm:$0xf] %vm508_vm1, %v502_v48  ;;  %v495_v51 = vpack.c.bf16 %v460_v50, %v460_v50  ;;  %v653_v27 = vsel %vm418_vm0, %v885_v26, 0 }
  0xb9   : > { %512 = vst.msk [vmem:[#allocation2 + $0xc] sm:$0xf] %vm508_vm1, %v495_v51 }
  0xba   : > { %v479_v52 = vpop.f32.mrf.mxu3 }
  0xbb   : > { %v480_v53 = vadd.f32 %v1178_v30, %v479_v52 }
  0xbc   : > { %v462_v55 = vpop.f32.mrf.mxu0 }
  0xbd   : > { %v503_v54 = vpack.c.bf16 %v480_v53, %v480_v53  ;;  %v463_v56 = vadd.f32 %v1178_v30, %v462_v55 }
  0xbf   : > { %520 = vst.msk [vmem:[#allocation2 + $0x2c] sm:$0xf] %vm508_vm1, %v503_v54  ;;  %v496_v57 = vpack.c.bf16 %v463_v56, %v463_v56 }
  0xc0   : > { %v882_v32 = vld [vmem:[#allocation2 + $0x8] sm:$0xff] }
  0xc1   : > { %513 = vst.msk [vmem:[#allocation2 + $0x10] sm:$0xf] %vm508_vm1, %v496_v57  ;;  %v644_v33 = vsel %vm418_vm0, %v882_v32, 0 }
  0xc2   : > { %v482_v58 = vpop.f32.mrf.mxu3 }
  0xc3   : > { %v483_v59 = vadd.f32 %v1178_v30, %v482_v58 }
  0xc4   : > { %v464_v61 = vpop.f32.mrf.mxu0 }
  0xc5   : > { %v504_v60 = vpack.c.bf16 %v483_v59, %v483_v59  ;;  %v465_v62 = vadd.f32 %v1178_v30, %v464_v61 }
  0xc6   : > { %v886_v22 = vld [vmem:[#allocation2 + $0x28] sm:$0xff] }
  0xc7   : > { %521 = vst.msk [vmem:[#allocation2 + $0x30] sm:$0xf] %vm508_vm1, %v504_v60  ;;  %v497_v63 = vpack.c.bf16 %v465_v62, %v465_v62  ;;  %v656_v24 = vsel %vm418_vm0, %v886_v22, 0 }
  0xc9   : > { %514 = vst.msk [vmem:[#allocation2 + $0x14] sm:$0xf] %vm508_vm1, %v497_v63 }
  0xca   : > { %v484_v0 = vpop.f32.mrf.mxu3 }
  0xcb   : > { %v485_v1 = vadd.f32 %v1178_v30, %v484_v0 }
  0xcc   : > { %v467_v3 = vpop.f32.mrf.mxu0 }
  0xcd   : > { %v505_v2 = vpack.c.bf16 %v485_v1, %v485_v1  ;;  %v468_v4 = vadd.f32 %v1178_v30, %v467_v3 }
  0xcf   : > { %522 = vst.msk [vmem:[#allocation2 + $0x34] sm:$0xf] %vm508_vm1, %v505_v2  ;;  %v498_v5 = vpack.c.bf16 %v468_v4, %v468_v4 }
  0xd1   : > { %515 = vst.msk [vmem:[#allocation2 + $0x18] sm:$0xf] %vm508_vm1, %v498_v5 }
  0xd2   : > { %v487_v6 = vpop.f32.mrf.mxu3 }
  0xd3   : > { %v488_v7 = vadd.f32 %v1178_v30, %v487_v6 }
  0xd4   : > { %v469_v9 = vpop.f32.mrf.mxu0 }
  0xd5   : > { %v506_v8 = vpack.c.bf16 %v488_v7, %v488_v7  ;;  %v470_v10 = vadd.f32 %v1178_v30, %v469_v9 }
  0xd6   : > { %v887_v17 = vld [vmem:[#allocation2 + $0x30] sm:$0xff] }
  0xd7   : > { %523 = vst.msk [vmem:[#allocation2 + $0x38] sm:$0xf] %vm508_vm1, %v506_v8  ;;  %v499_v11 = vpack.c.bf16 %v470_v10, %v470_v10  ;;  %v659_v18 = vsel %vm418_vm0, %v887_v17, 0 }
  0xd9   : > { %516 = vst.msk [vmem:[#allocation2 + $0x1c] sm:$0xf] %vm508_vm1, %v499_v11 }
  0xda   : > { %v489_v12 = vpop.f32.mrf.mxu3 }
  0xdb   : > { %v490_v13 = vadd.f32 %v1178_v30, %v489_v12  ;;  %v883_v30 = vld [vmem:[#allocation2 + $0x10] sm:$0xff] }
  0xdc   : > { %v647_v31 = vsel %vm418_vm0, %v883_v30, 0 }
  0xdd   : > { %v507_v14 = vpack.c.bf16 %v490_v13, %v490_v13 }
  0xdf   : > { %524 = vst.msk [vmem:[#allocation2 + $0x3c] sm:$0xf] %vm508_vm1, %v507_v14 }
  0xe0   : > { %v884_v28 = vld [vmem:[#allocation2 + $0x18] sm:$0xff] }
  0xe1   : > { %v650_v29 = vsel %vm418_vm0, %v884_v28, 0 }
  0xe6   : > { %v888_v15 = vld [vmem:[#allocation2 + $0x38] sm:$0xff] }
  0xe7   : > { %v662_v16 = vsel %vm418_vm0, %v888_v15, 0 }
  0xe8   : > { %664 = vmatpush.bf16.xpose.msra.mxu2 %v662_v16 }
  0xf0   : > { %665 = vmatpush.bf16.xpose.msra.mxu2 %v659_v18 }
  0xf8   : > { %666 = vmatpush.bf16.xpose.msra.mxu2 %v656_v24 }
 0x100   : > { %667 = vmatpush.bf16.xpose.msra.mxu2 %v653_v27 }
 0x108   : > { %668 = vmatpush.bf16.xpose.msra.mxu2 %v650_v29 }
 0x110   : > { %669 = vmatpush.bf16.xpose.msra.mxu2 %v647_v31 }
 0x118   : > { %670 = vmatpush.bf16.xpose.msra.mxu2 %v644_v33 }
 0x120   : > { %671 = vmatpush.bf16.xpose.msra.mxu2 %v641_v35 }
 0x127   : > { %871 = vmatmul.msk.bf16.vlgmr.msra.gmra.mxu2 %vm418_vm0, %v575_v36 }
 0x1aa   : > { %v673_v38 = vpop.f32.mrf.mxu2 }
 0x1ab   : > { %v674_v39 = vadd.f32 %v948_v37, %v673_v38 }
 0x1ad   : > { %677 = vst [vmem:[%s345_s23] sm:$0xff] %v674_v39 }
 0x1ae   : > { %976 = shalt.err (!%p973_p5)
}
 0x1af   : > { %891 = dma.vmem_to_hbm [thread:$0]  (%p1109_p4), %s694_s8, 128, %s696_s10, %s679_s27  }
 0x1b2   : > { %v675_v40 = vpop.f32.mrf.mxu2 }
 0x1b3 PF: > { %p897_p6 = scmp.ge.s32.totalorder %s1027_s29, 2  ;;  %s707_s12 = sand.u32 1, %s1007_s24  }
 0x1b4   : > { %s708_s18 = scalar_lea.sflag [#allocation5], %s707_s12 }
 0x1b5   : > { %p894_p7 = pnand %p897_p6, %p1116_p8 }
 0x1b7   : > { %p895_p9 = pneg %p894_p7 }
 0x1b9   : > { %1002 = dma.done.wait (%p895_p9), %s708_s18, 128  }
 0x1ba   : > { %1004 = vsyncadd (%p895_p9), %s708_s18, 4294967168  ;;  %s20_s29 = sadd.s32 1, %s1027_s29   ;;  %s1285_s24 = smov %s1011_s25 }
 0x1bb   : > { %p17_p10 = scmp.ge.s32.totalorder %s20_s29, 4   ;;  %s1286_s25 = smov %s1015_s26 }
 0x1bc   : > { %s1287_s26 = smov %s1122_s14  ;;  %s1288_s27 = smov %s1023_s28 }
 0x1bd   : > { %s1289_s28 = smov %s1291_s9  ;;  %19 = sbr.rel (!%p17_p10) target bundleno = 7 (0x7), region = 99 }
 0x1c2   :  { %714 = vsyncpa [#allocation5], 1 }
 0x1c3   :  { %716 = vsyncpa [#allocation5 + $0x1], 1 }

</bundles_post_ra>
